<compile_context>
chip_gen: v7x
topology: tpu7x:2x2x1
jax: 0.10.0
libtpu: 0.0.40
codegen_flags: <defaults>
</compile_context>

<pallas_src>
import functools

import numpy as np

import jax
import jax.numpy as jnp
from jax.experimental import pallas as pl
from jax.experimental.pallas import tpu as pltpu


# ------------------------------ shape helpers ---------------------------------

def _divisors(n):
    return [d for d in range(1, n + 1) if n % d == 0]


def _derived_shapes(Cin, H, W, kh, kw, sh, sw, ph, pw):
    Hp, Wp = H + 2 * ph, W + 2 * pw
    Ho = (Hp - kh) // sh + 1
    Wo = (Wp - kw) // sw + 1
    K = Wp * Cin                         # lane-dense contraction width
    Kp = ((K + 127) // 128) * 128        # padded to a multiple of 128 lanes
    return Hp, Wp, Ho, Wo, K, Kp


def _pick_wo_tile(Wo, Cout, kh, Kp, weight_budget_bytes=6 << 20):
    """Largest Wo tile whose Toeplitz-weight slice fits the VMEM budget."""
    def w_bytes(t):
        return kh * Kp * t * Cout * 2            # bf16
    if w_bytes(Wo) <= weight_budget_bytes:
        return Wo
    for t in sorted(_divisors(Wo), reverse=True):
        if t < Wo and (t * Cout) % 128 == 0 and w_bytes(t) <= weight_budget_bytes:
            return t
    # TODO(synk): no lane-aligned Wo tile fits the budget -> needs band-limited
    # K tiling; fall back to the full weight and rely on vmem_limit_bytes.
    return Wo


def _pick_batch_block(N, Hp, Kp, Ho, TWoC, act_budget_bytes=4 << 20):
    """Largest batch block keeping >=2 grid steps (dual-TC v7x) within budget."""
    min_steps = 2 if N >= 2 else 1
    def act_bytes(nb):
        return nb * (Hp * Kp + Ho * TWoC) * 2    # bf16 in + out, single copy
    for nb in sorted(_divisors(N), reverse=True):
        if nb <= max(N // min_steps, 1) and act_bytes(nb) <= act_budget_bytes:
            return nb
    return 1


@functools.lru_cache(maxsize=None)
def _single_buffer_supported():
    """Probe whether pipeline_mode=pl.Buffered(1) lowers+compiles on this stack."""
    try:
        def _k(a_ref, w_ref, o_ref):
            o_ref[...] = a_ref[...] + w_ref[...]
        f = pl.pallas_call(
            _k,
            out_shape=jax.ShapeDtypeStruct((16, 128), jnp.float32),
            grid=(2, 1),
            in_specs=[
                pl.BlockSpec((8, 128), lambda n, j: (n, 0)),
                pl.BlockSpec((8, 128), lambda n, j: (0, 0),
                             pipeline_mode=pl.Buffered(1)),
            ],
            out_specs=pl.BlockSpec((8, 128), lambda n, j: (n, 0)),
            compiler_params=pltpu.CompilerParams(
                dimension_semantics=("parallel", "arbitrary")),
        )
        jax.jit(f).lower(jax.ShapeDtypeStruct((16, 128), jnp.float32),
                         jax.ShapeDtypeStruct((8, 128), jnp.float32)).compile()
        return True
    except Exception:
        return False


# ------------------------------ Pallas kernel ----------------------------------

def _make_conv_bn_relu_kernel(kh, Ho, sh, Nb):
    """sum_dh  x_rows(dh) @ W_toeplitz[dh]  ->  * scale + bias -> ReLU.

    x_ref : (Nb, Hp, Kp)        bf16   padded, lane-dense activations
    w_ref : (kh, Kp, TWo*Cout)  bf16   width-Toeplitz conv weight (no BN scale)
    s_ref : (1, TWo*Cout)       f32    folded BN scale (gamma/sqrt(var+eps))
    b_ref : (1, TWo*Cout)       f32    folded BN/conv bias
    o_ref : (Nb, Ho, TWo*Cout)  bf16   lane-dense output
    """

    def kernel(x_ref, w_ref, s_ref, b_ref, o_ref):
        Kp = x_ref.shape[-1]
        TWoC = o_ref.shape[-1]

        def x_rows(dh):
            if sh == 1:
                rows = x_ref[:, dh:dh + Ho, :]
            else:
                # TODO(synk): strided-height path (sh > 1) is not exercised by
                # the demo; validate before relying on strided ConvBlocks.
                rows = x_ref[:, pl.ds(dh, Ho, stride=sh), :]
            # Stack the Nb images along the matmul M dim.
            return rows.reshape(Nb * Ho, Kp)

        acc = jnp.dot(x_rows(0), w_ref[0], preferred_element_type=jnp.float32)
        for dh in range(1, kh):
            acc = acc + jnp.dot(x_rows(dh), w_ref[dh],
                                preferred_element_type=jnp.float32)

        # Epilogue in f32 (v5e VPU has no bf16 math): BN scale + bias + ReLU.
        y = acc * s_ref[...] + b_ref[...]
        y = jnp.maximum(y, 0.0)
        o_ref[...] = y.reshape(Nb, Ho, TWoC).astype(o_ref.dtype)

    return kernel


# ----------------------- parameter folding (host side) --------------------------

def fold_bn(b_conv, gamma, beta, run_mean, run_var, eps):
    """Eval-mode BatchNorm fold: per-channel scale + bias applied post-conv."""
    b = np.asarray(b_conv, np.float32)
    scale = np.asarray(gamma, np.float32) / np.sqrt(np.asarray(run_var, np.float32) + eps)
    bias = np.asarray(beta, np.float32) + scale * (b - np.asarray(run_mean, np.float32))
    return scale, bias


def build_kernel_params(w_oihw, b_conv, gamma, beta, run_mean, run_var, eps,
                        H, W, kh, kw, sh, sw, ph, pw):
    """Width-Toeplitz conv weight (bf16, K padded to 128) + f32 scale/bias lanes."""
    w = np.asarray(w_oihw, np.float32)
    Cout, Cin = w.shape[0], w.shape[1]
    _, _, _, Wo, _, Kp = _derived_shapes(Cin, H, W, kh, kw, sh, sw, ph, pw)

    # (Cout, Cin, kh, kw) -> (kh, kw, Cin, Cout)
    w4 = np.transpose(w, (2, 3, 1, 0))

    # wt[dh, wp*Cin + ci, ow*Cout + co] = w4[dh, wp - ow*sw, ci, co]; rows beyond
    # Wp*Cin stay zero (they face the zero lane-padding of the activation).
    wt = np.zeros((kh, Kp, Wo, Cout), np.float32)
    for dw in range(kw):
        for ow in range(Wo):
            wp = ow * sw + dw
            wt[:, wp * Cin:(wp + 1) * Cin, ow, :] = w4[:, dw]
    wt = wt.reshape(kh, Kp, Wo * Cout)

    scale, bias = fold_bn(b_conv, gamma, beta, run_mean, run_var, eps)
    scale_dense = np.tile(scale, Wo).reshape(1, Wo * Cout)
    bias_dense = np.tile(bias, Wo).reshape(1, Wo * Cout)

    return (jnp.asarray(wt, jnp.bfloat16),
            jnp.asarray(scale_dense, jnp.float32),
            jnp.asarray(bias_dense, jnp.float32))


# ------------------------------ forward wrappers --------------------------------

def make_conv_block_fn(Cin, Cout, H, W, kh, kw, sh, sw, ph, pw,
                       out_dtype=jnp.bfloat16):
    """Returns (forward_nchw, forward_lane); both jitted.

    forward_lane keeps activations in the lane-dense (N, H, W*C) layout so a
    chain of ConvBlocks never pays NCHW<->NHWC transposes between layers.
    """
    Hp, Wp, Ho, Wo, K, Kp = _derived_shapes(Cin, H, W, kh, kw, sh, sw, ph, pw)
    TWo = _pick_wo_tile(Wo, Cout, kh, Kp)
    nWo = Wo // TWo
    TWoC = TWo * Cout
    # Weight/scale/bias are grid-invariant only when nWo == 1; only then may
    # they be single-buffered (and only if the installed Pallas supports it).
    single_buf = (nWo == 1) and _single_buffer_supported()

    def const_spec(shape, index_map):
        if single_buf:
            return pl.BlockSpec(shape, index_map, pipeline_mode=pl.Buffered(1))
        return pl.BlockSpec(shape, index_map)

    def _forward_lane(x_lane, w_toeplitz, scale_dense, bias_dense):
        """(N, H, W*Cin) lane-dense -> (N, Ho, Wo*Cout) lane-dense bf16."""
        N = x_lane.shape[0]
        Nb = _pick_batch_block(N, Hp, Kp, Ho, TWoC)
        nN = N // Nb

        # bf16 BEFORE padding (halves glue HBM bytes); one pad supplies the
        # H pad, the W pad (pw*Cin lanes each side) and the K->Kp alignment.
        x = x_lane.astype(jnp.bfloat16)
        x = jnp.pad(x, ((0, 0), (ph, ph), (pw * Cin, Kp - K + pw * Cin)))

        kernel = _make_conv_bn_relu_kernel(kh, Ho, sh, Nb)

        # Explicit VMEM budget (double-buffered activations, weight x1 or x2,
        # f32 accumulator + headroom); raise the scoped limit only if needed.
        vmem_est = int(1.5 * (2 * Nb * Hp * Kp * 2
                              + 2 * Nb * Ho * TWoC * 2
                              + (1 if single_buf else 2) * kh * Kp * TWoC * 2
                              + 4 * TWoC * 4
                              + 2 * Nb * Ho * TWoC * 4))
        cparams = dict(dimension_semantics=("parallel", "arbitrary"))
        if vmem_est > (12 << 20):
            cparams["vmem_limit_bytes"] = min(max(vmem_est, 16 << 20), 48 << 20)

        out = pl.pallas_call(
            kernel,
            out_shape=jax.ShapeDtypeStruct((N, Ho, Wo * Cout), out_dtype),
            grid=(nN, nWo),
            in_specs=[
                # Nb full padded images per step; constant index over the Wo
                # axis -> stays resident, no re-DMA across Wo tiles.
                pl.BlockSpec((Nb, Hp, Kp), lambda n, j: (n, 0, 0)),
                const_spec((kh, Kp, TWoC), lambda n, j: (0, 0, j)),
                const_spec((1, TWoC), lambda n, j: (0, j)),
                const_spec((1, TWoC), lambda n, j: (0, j)),
            ],
            out_specs=pl.BlockSpec((Nb, Ho, TWoC), lambda n, j: (n, 0, j)),
            compiler_params=pltpu.CompilerParams(**cparams),
        )(x, w_toeplitz, scale_dense, bias_dense)
        return out

    def _forward_nchw(x_nchw, w_toeplitz, scale_dense, bias_dense):
        N = x_nchw.shape[0]
        x = jnp.transpose(x_nchw.astype(jnp.bfloat16), (0, 2, 3, 1))
        x = x.reshape(N, H, W * Cin)
        out = _forward_lane(x, w_toeplitz, scale_dense, bias_dense)
        out = out.reshape(N, Ho, Wo, Cout)
        return jnp.transpose(out, (0, 3, 1, 2))

    return jax.jit(_forward_nchw), jax.jit(_forward_lane)


# ------------------------------ plain-JAX reference -----------------------------

def conv_bn_relu_ref(x_nchw, w_oihw, scale, bias, kh, kw, sh, sw, ph, pw):
    """f32 reference: Conv2d (no bias) -> *scale + bias -> ReLU."""
    N, Cin, H, W = x_nchw.shape
    Cout = w_oihw.shape[0]
    Ho = (H + 2 * ph - kh) // sh + 1
    Wo = (W + 2 * pw - kw) // sw + 1
    xp = jnp.pad(x_nchw, ((0, 0), (0, 0), (ph, ph), (pw, pw)))
    taps = []
    for dh in range(kh):
        for dw in range(kw):
            taps.append(xp[:, :, dh:dh + sh * Ho:sh, dw:dw + sw * Wo:sw])
    pat = jnp.stack(taps, axis=0)                                  # (T,N,Cin,Ho,Wo)
    wr = jnp.transpose(w_oihw, (2, 3, 0, 1)).reshape(kh * kw, Cout, Cin)
    out = jnp.einsum('tnchw,toc->nohw', pat, wr)
    out = out * scale[None, :, None, None] + bias[None, :, None, None]
    return jnp.maximum(out, 0.0)


# ------------------------------------- main -------------------------------------

if __name__ == "__main__":
    key = jax.random.PRNGKey(0)
    kx, kw_, kb, kg, kbe, km, kv = jax.random.split(key, 7)

    # ConvBlock(in_fea=4, out_fea=16, kernel_size=3, stride=1, padding=1)
    batch, in_fea, out_fea = 4, 4, 16
    H = W = 16
    kh = kw = 3
    sh = sw = 1
    ph = pw = 1
    eps = 1e-5

    x = jax.random.normal(kx, (batch, in_fea, H, W), dtype=jnp.float32)

    # PyTorch-default Conv2d init; eval-mode BatchNorm2d with non-trivial
    # affine params / running stats so the BN fold is actually exercised.
    # TODO(synk): training-mode BatchNorm (batch statistics) is not implemented;
    # the fold assumes module.eval() (running statistics).
    fan_in = in_fea * kh * kw
    bound = 1.0 / float(np.sqrt(fan_in))
    w_conv = jax.random.uniform(kw_, (out_fea, in_fea, kh, kw),
                                jnp.float32, -bound, bound)
    b_conv = jax.random.uniform(kb, (out_fea,), jnp.float32, -bound, bound)
    gamma = np.asarray(jax.random.uniform(kg, (out_fea,), jnp.float32, 0.5, 1.5))
    beta = np.asarray(jax.random.normal(kbe, (out_fea,)) * 0.1, np.float32)
    run_mean = np.asarray(jax.random.normal(km, (out_fea,)) * 0.1, np.float32)
    run_var = np.asarray(jax.random.uniform(kv, (out_fea,), jnp.float32, 0.5, 1.5))

    # Host-side, one-time parameter transform (Toeplitz expansion + BN fold).
    w_toeplitz, scale_dense, bias_dense = build_kernel_params(
        np.asarray(w_conv), np.asarray(b_conv), gamma, beta, run_mean, run_var,
        eps, H, W, kh, kw, sh, sw, ph, pw)

    fwd_nchw, fwd_lane = make_conv_block_fn(in_fea, out_fea, H, W,
                                            kh, kw, sh, sw, ph, pw)

    out = jax.block_until_ready(fwd_nchw(x, w_toeplitz, scale_dense, bias_dense))

    # Lane-dense entry point (what a chained ConvBlock stack would use).
    x_lane = jnp.transpose(x.astype(jnp.bfloat16), (0, 2, 3, 1)).reshape(
        batch, H, W * in_fea)
    out_lane = jax.block_until_ready(
        fwd_lane(x_lane, w_toeplitz, scale_dense, bias_dense))

    # ---- checks ----
    Ho = (H + 2 * ph - kh) // sh + 1
    Wo = (W + 2 * pw - kw) // sw + 1
    assert out.shape == (batch, out_fea, Ho, Wo), out.shape
    assert out_lane.shape == (batch, Ho, Wo * out_fea), out_lane.shape
    assert bool(jnp.all(jnp.isfinite(out)))
    assert bool(jnp.all(out >= 0.0))                      # ReLU output

    # NCHW and lane-dense paths run the same kernel -> must agree.
    out_lane_nchw = jnp.transpose(out_lane.reshape(batch, Ho, Wo, out_fea),
                                  (0, 3, 1, 2))
    lane_err = float(jnp.max(jnp.abs(out.astype(jnp.float32)
                                     - out_lane_nchw.astype(jnp.float32))))
    assert lane_err < 1e-6, lane_err

    # Numerical check against a plain-JAX f32 reference using the same bf16
    # rounding of activations / conv weights (only accumulation order and the
    # bf16 output store differ).
    scale_ref, bias_ref = fold_bn(np.asarray(b_conv), gamma, beta,
                                  run_mean, run_var, eps)
    x_r = x.astype(jnp.bfloat16).astype(jnp.float32)
    w_r = w_conv.astype(jnp.bfloat16).astype(jnp.float32)
    ref = conv_bn_relu_ref(x_r, w_r, jnp.asarray(scale_ref), jnp.asarray(bias_ref),
                           kh, kw, sh, sw, ph, pw)
    max_err = float(jnp.max(jnp.abs(out.astype(jnp.float32) - ref)))
    assert max_err < 5e-2, f"max abs error {max_err}"

    print("KERNEL_OK")
</pallas_src>

<mosaic_0001>
module attributes {stable_mosaic.version = 11 : i64} {
  func.func @kernel(%arg0: i32, %arg1: i32, %arg2: memref<2x18x128xbf16, #tpu.memory_space<vmem>>, %arg3: memref<3x128x256xbf16, #tpu.memory_space<vmem>>, %arg4: memref<1x256xf32, #tpu.memory_space<vmem>>, %arg5: memref<1x256xf32, #tpu.memory_space<vmem>>, %arg6: memref<2x16x256xbf16, #tpu.memory_space<vmem>>) attributes {dimension_semantics = [#tpu.dimension_semantics<parallel>, #tpu.dimension_semantics<arbitrary>], iteration_bounds = array<i64: 2, 1>, scalar_prefetch = 0 : i64, scratch_operands = 0 : i64, tpu.core_type = #tpu.core_type<tc>, window_params = [{transform_indices = @transform_0, window_bounds = array<i64: 2, 18, 128>}, {transform_indices = @transform_1, window_bounds = array<i64: 3, 128, 256>}, {transform_indices = @transform_2, window_bounds = array<i64: 1, 256>}, {transform_indices = @transform_3, window_bounds = array<i64: 1, 256>}, {transform_indices = @transform_4, window_bounds = array<i64: 2, 16, 256>}]} {
    %c0 = arith.constant 0 : index
    %c0_0 = arith.constant 0 : index
    %c0_1 = arith.constant 0 : index
    %0 = vector.load %arg2[%c0, %c0_0, %c0_1] : memref<2x18x128xbf16, #tpu.memory_space<vmem>>, vector<2x16x128xbf16>
    %1 = vector.shape_cast %0 : vector<2x16x128xbf16> to vector<32x128xbf16>
    %c0_2 = arith.constant 0 : index
    %c0_3 = arith.constant 0 : index
    %c0_4 = arith.constant 0 : index
    %2 = vector.load %arg3[%c0_2, %c0_3, %c0_4] : memref<3x128x256xbf16, #tpu.memory_space<vmem>>, vector<1x128x256xbf16>
    %3 = vector.shape_cast %2 : vector<1x128x256xbf16> to vector<128x256xbf16>
    %cst = arith.constant dense<0.000000e+00> : vector<32x256xf32>
    %4 = tpu.matmul %1, %3, %cst {dimension_numbers = #tpu.dot_dimension_numbers<[1], [0], [0], [1], [0, 0, 1, 1], [], []>} : vector<32x128xbf16>, vector<128x256xbf16>, vector<32x256xf32> -> vector<32x256xf32>
    %c0_5 = arith.constant 0 : index
    %c1 = arith.constant 1 : index
    %c0_6 = arith.constant 0 : index
    %5 = vector.load %arg2[%c0_5, %c1, %c0_6] : memref<2x18x128xbf16, #tpu.memory_space<vmem>>, vector<2x16x128xbf16>
    %6 = vector.shape_cast %5 : vector<2x16x128xbf16> to vector<32x128xbf16>
    %c1_7 = arith.constant 1 : index
    %c0_8 = arith.constant 0 : index
    %c0_9 = arith.constant 0 : index
    %7 = vector.load %arg3[%c1_7, %c0_8, %c0_9] : memref<3x128x256xbf16, #tpu.memory_space<vmem>>, vector<1x128x256xbf16>
    %8 = vector.shape_cast %7 : vector<1x128x256xbf16> to vector<128x256xbf16>
    %cst_10 = arith.constant dense<0.000000e+00> : vector<32x256xf32>
    %9 = tpu.matmul %6, %8, %cst_10 {dimension_numbers = #tpu.dot_dimension_numbers<[1], [0], [0], [1], [0, 0, 1, 1], [], []>} : vector<32x128xbf16>, vector<128x256xbf16>, vector<32x256xf32> -> vector<32x256xf32>
    %10 = arith.addf %4, %9 : vector<32x256xf32>
    %c0_11 = arith.constant 0 : index
    %c2 = arith.constant 2 : index
    %c0_12 = arith.constant 0 : index
    %11 = vector.load %arg2[%c0_11, %c2, %c0_12] : memref<2x18x128xbf16, #tpu.memory_space<vmem>>, vector<2x16x128xbf16>
    %12 = vector.shape_cast %11 : vector<2x16x128xbf16> to vector<32x128xbf16>
    %c2_13 = arith.constant 2 : index
    %c0_14 = arith.constant 0 : index
    %c0_15 = arith.constant 0 : index
    %13 = vector.load %arg3[%c2_13, %c0_14, %c0_15] : memref<3x128x256xbf16, #tpu.memory_space<vmem>>, vector<1x128x256xbf16>
    %14 = vector.shape_cast %13 : vector<1x128x256xbf16> to vector<128x256xbf16>
    %cst_16 = arith.constant dense<0.000000e+00> : vector<32x256xf32>
    %15 = tpu.matmul %12, %14, %cst_16 {dimension_numbers = #tpu.dot_dimension_numbers<[1], [0], [0], [1], [0, 0, 1, 1], [], []>} : vector<32x128xbf16>, vector<128x256xbf16>, vector<32x256xf32> -> vector<32x256xf32>
    %16 = arith.addf %10, %15 : vector<32x256xf32>
    %c0_17 = arith.constant 0 : index
    %c0_18 = arith.constant 0 : index
    %17 = vector.load %arg4[%c0_17, %c0_18] : memref<1x256xf32, #tpu.memory_space<vmem>>, vector<1x256xf32>
    %18 = vector.broadcast %17 : vector<1x256xf32> to vector<32x256xf32>
    %19 = arith.mulf %16, %18 : vector<32x256xf32>
    %c0_19 = arith.constant 0 : index
    %c0_20 = arith.constant 0 : index
    %20 = vector.load %arg5[%c0_19, %c0_20] : memref<1x256xf32, #tpu.memory_space<vmem>>, vector<1x256xf32>
    %21 = vector.broadcast %20 : vector<1x256xf32> to vector<32x256xf32>
    %22 = arith.addf %19, %21 : vector<32x256xf32>
    %cst_21 = arith.constant 0.000000e+00 : f32
    %23 = vector.broadcast %cst_21 : f32 to vector<32x256xf32>
    %24 = arith.maximumf %22, %23 : vector<32x256xf32>
    %25 = vector.shape_cast %24 : vector<32x256xf32> to vector<2x16x256xf32>
    %26 = arith.truncf %25 : vector<2x16x256xf32> to vector<2x16x256xbf16>
    %c0_22 = arith.constant 0 : index
    %c0_23 = arith.constant 0 : index
    %c0_24 = arith.constant 0 : index
    %27 = vector.load %arg6[%c0_22, %c0_23, %c0_24] : memref<2x16x256xbf16, #tpu.memory_space<vmem>>, vector<2x16x256xbf16>
    tpu.vector_store %arg6[%c0_22, %c0_23, %c0_24], %26 {strides = array<i32>} : memref<2x16x256xbf16, #tpu.memory_space<vmem>>, vector<2x16x256xbf16>,
    return
  }
  func.func @transform_0(%arg0: i32, %arg1: i32) -> (i32, i32, i32) {
    %c0_i32 = arith.constant 0 : i32
    %c0_i32_0 = arith.constant 0 : i32
    %c0_i32_1 = arith.constant 0 : i32
    return %arg0, %c0_i32, %c0_i32_0 : i32, i32, i32
  }
  func.func @transform_1(%arg0: i32, %arg1: i32) -> (i32, i32, i32) {
    %c0_i32 = arith.constant 0 : i32
    %c0_i32_0 = arith.constant 0 : i32
    %c0_i32_1 = arith.constant 0 : i32
    return %c0_i32, %c0_i32_0, %arg1 : i32, i32, i32
  }
  func.func @transform_2(%arg0: i32, %arg1: i32) -> (i32, i32) {
    %c0_i32 = arith.constant 0 : i32
    %c0_i32_0 = arith.constant 0 : i32
    return %c0_i32, %arg1 : i32, i32
  }
  func.func @transform_3(%arg0: i32, %arg1: i32) -> (i32, i32) {
    %c0_i32 = arith.constant 0 : i32
    %c0_i32_0 = arith.constant 0 : i32
    return %c0_i32, %arg1 : i32, i32
  }
  func.func @transform_4(%arg0: i32, %arg1: i32) -> (i32, i32, i32) {
    %c0_i32 = arith.constant 0 : i32
    %c0_i32_0 = arith.constant 0 : i32
    return %arg0, %c0_i32, %arg1 : i32, i32, i32
  }
}

</mosaic_0001>

<bundles_post_ra>
// kernel: _forward_nchw.1
= control target key start
LH: loop header
LB: loop body
LE: loop exit
PB: predicated region body
PF: predicated region fallthrough
CT: control target
= control target key end

     0   :  { %s1348_s15 = smov 0   ;;  %s1350_s16 = smov 0   ;;  %s1588_s0 = inlined_call_operand.vmem [shape: bf16[4,18,128], index: 0, kind: input, shape index: {}]   ;;  %s1589_s1 = inlined_call_operand.vmem [shape: bf16[3,128,256], index: 1, kind: input, shape index: {}]   ;;  %s1590_s2 = inlined_call_operand.vmem [shape: f32[1,256], index: 2, kind: input, shape index: {}]   ;;  %s1591_s3 = inlined_call_operand.vmem [shape: f32[1,256], index: 3, kind: input, shape index: {}]   ;;  %s1592_s4 = inlined_call_operand.vmem [shape: bf16[4,16,256], index: 4, kind: output, shape index: {}]  }
   0x1   :  { %s1352_s17 = smov 0  }
   0x2 LB: > { %s26_s18 = sadd.s32 1, %s1316_s16  ;;  %p1061_p0 = scmp.ge.s32.totalorder %s1320_s17, 1  ;;  %s1320_s17 = sphi %s1352_s17, %s14_s17   ;;  %s1316_s16 = sphi %s1350_s16, %s1596_s16   ;;  %s1312_s15 = sphi %s1348_s15, %s1595_s15  }
   0x3   : > { %p28_p1 = scmp.ge.s32.totalorder %s26_s18, 2  ;;  %p209_p2 = scmp.lt.s32.totalorder %s1320_s17, 3 }
   0x5   : > { %s1598_s18 = smov (%p28_p1, %s26_s18), 0  ;;  %p210_p3 = pnand %p1061_p0, %p209_p2 }
   0x6   : > { %v1224_v0 = vld [vmem:[%s1589_s1 + $0x84] ss:$8 sps:$4 sm:$0xff] (!%p210_p3)   ;;  %v1322_v2 = vmov (!%p210_p3), 0   ;;  %v1228_v3 = vld [vmem:[%s1589_s1 + $0x80] ss:$8 sps:$4 sm:$0xff] (!%p210_p3)   ;;  %s1062_s29 = sshll.u32 (!%p210_p3), %s1312_s15, 1 }
   0x7   : > { %213 = sbr.rel (%p210_p3) target bundleno = 298 (0x12a), region = 36  ;;  %v1226_v1 = vld [vmem:[%s1589_s1 + $0x4] ss:$8 sps:$4 sm:$0xff] (!%p210_p3)   ;;  %500 = vmatprep.mubr.bf16.mxu1 (!%p210_p3), %v1322_v2  ;;  %645 = vmatprep.mubr.bf16.mxu0 (!%p210_p3), %v1322_v2  ;;  %v1229_v4 = vld [vmem:[%s1589_s1] ss:$8 sps:$4 sm:$0xff] (!%p210_p3)   ;;  %p255_p4 = scmp.lt.s32.totalorder (!%p210_p3), %s1062_s29, 3 }
   0x8   : > { %468 = vmatprep.subr.bf16.mxu1 (!%p210_p3), %v1224_v0  ;;  %613 = vmatprep.subr.bf16.mxu0 (!%p210_p3), %v1226_v1  ;;  %v1230_v5 = vld [vmem:[%s1589_s1 + $0x94] ss:$8 sps:$4 sm:$0xff] (!%p210_p3)   ;;  %v1234_v7 = vld [vmem:[%s1589_s1 + $0x90] ss:$8 sps:$4 sm:$0xff] (!%p210_p3)   ;;  %v1236_v9 = vld [vmem:[%s1589_s1 + $0xa4] ss:$8 sps:$4 sm:$0xff] (!%p210_p3)  }
   0x9   : > { %469 = vmatpush1.bf16.msra.mxu1 (!%p210_p3), %v1228_v3  ;;  %614 = vmatpush1.bf16.msra.mxu0 (!%p210_p3), %v1229_v4  ;;  %v1232_v6 = vld [vmem:[%s1589_s1 + $0x14] ss:$8 sps:$4 sm:$0xff] (!%p210_p3)   ;;  %v1235_v8 = vld [vmem:[%s1589_s1 + $0x10] ss:$8 sps:$4 sm:$0xff] (!%p210_p3)   ;;  %v1238_v10 = vld [vmem:[%s1589_s1 + $0x24] ss:$8 sps:$4 sm:$0xff] (!%p210_p3)  }
   0xa   : > { %470 = vmatprep.subr.bf16.mxu1 (!%p210_p3), %v1230_v5  ;;  %615 = vmatprep.subr.bf16.mxu0 (!%p210_p3), %v1232_v6  ;;  %v1240_v11 = vld [vmem:[%s1589_s1 + $0xa0] ss:$8 sps:$4 sm:$0xff] (!%p210_p3)   ;;  %v1242_v13 = vld [vmem:[%s1589_s1 + $0xb4] ss:$8 sps:$4 sm:$0xff] (!%p210_p3)   ;;  %v1246_v15 = vld [vmem:[%s1589_s1 + $0xb0] ss:$8 sps:$4 sm:$0xff] (!%p210_p3)  }
   0xb   : > { %v1241_v12 = vld [vmem:[%s1589_s1 + $0x20] ss:$8 sps:$4 sm:$0xff] (!%p210_p3)   ;;  %v1244_v14 = vld [vmem:[%s1589_s1 + $0x34] ss:$8 sps:$4 sm:$0xff] (!%p210_p3)   ;;  %v1247_v16 = vld [vmem:[%s1589_s1 + $0x30] ss:$8 sps:$4 sm:$0xff] (!%p210_p3)  }
   0xc   : > { %v1248_v17 = vld [vmem:[%s1589_s1 + $0xc4] ss:$8 sps:$4 sm:$0xff] (!%p210_p3)   ;;  %v1252_v19 = vld [vmem:[%s1589_s1 + $0xc0] ss:$8 sps:$4 sm:$0xff] (!%p210_p3)   ;;  %v1254_v21 = vld [vmem:[%s1589_s1 + $0xd4] ss:$8 sps:$4 sm:$0xff] (!%p210_p3)  }
   0xd   : > { %471 = vmatpush1.bf16.msra.mxu1 (!%p210_p3), %v1234_v7  ;;  %616 = vmatpush1.bf16.msra.mxu0 (!%p210_p3), %v1235_v8  ;;  %v1250_v18 = vld [vmem:[%s1589_s1 + $0x44] ss:$8 sps:$4 sm:$0xff] (!%p210_p3)   ;;  %v1253_v20 = vld [vmem:[%s1589_s1 + $0x40] ss:$8 sps:$4 sm:$0xff] (!%p210_p3)   ;;  %v1256_v22 = vld [vmem:[%s1589_s1 + $0x54] ss:$8 sps:$4 sm:$0xff] (!%p210_p3)  }
   0xe   : > { %472 = vmatprep.subr.bf16.mxu1 %v1236_v9  ;;  %617 = vmatprep.subr.bf16.mxu0 %v1238_v10  ;;  %s1600_s29 = smov (!%p255_p4, %s1062_s29), 3  ;;  %vm312_vm0 = vsmask.f32 3328  ;;  %v1258_v23 = vld [vmem:[%s1589_s1 + $0xd0] ss:$8 sps:$4 sm:$0xff]   ;;  %vm672_vm3 = vcmask 1042432  }
   0xf   : > { %s1198_s8 = smul.u32 12, %s1600_s29  ;;  %vm313_vm1 = vsmask.f32 7440  ;;  %v1259_v24 = vld [vmem:[%s1589_s1 + $0x50] ss:$8 sps:$4 sm:$0xff]   ;;  %vm673_vm4 = vcmask 1046532  }
  0x10   : > { %v1260_v25 = vld [vmem:[%s1589_s1 + $0xe4] ss:$8 sps:$4 sm:$0xff]   ;;  %v1264_v29 = vld [vmem:[%s1589_s1 + $0xe0] ss:$8 sps:$4 sm:$0xff]   ;;  %v1266_v37 = vld [vmem:[%s1589_s1 + $0xf4] ss:$8 sps:$4 sm:$0xff]  }
  0x11   : > { %473 = vmatpush1.bf16.msra.mxu1 %v1240_v11  ;;  %618 = vmatpush1.bf16.msra.mxu0 %v1241_v12  ;;  %s1443_s22 = scalar_lea.vmem %s1588_s0, %s1198_s8  ;;  %v1262_v26 = vld [vmem:[%s1589_s1 + $0x64] ss:$8 sps:$4 sm:$0xff]   ;;  %v1265_v35 = vld [vmem:[%s1589_s1 + $0x60] ss:$8 sps:$4 sm:$0xff]   ;;  %v1268_v42 = vld [vmem:[%s1589_s1 + $0x74] ss:$8 sps:$4 sm:$0xff]  }
  0x12   : > { %474 = vmatprep.subr.bf16.mxu1 %v1242_v13  ;;  %619 = vmatprep.subr.bf16.mxu0 %v1244_v14  ;;  %v290_v27 = vld [vmem:[%s1443_s22] sm:$0xf]  ;;  %v1459_v28 = vld [vmem:[%s1443_s22 + $0x4] sm:$0xf]  ;;  %v1465_v30 = vld [vmem:[%s1443_s22 + $0x8] sm:$0x1] }
  0x13   : > { %v316_v31 = vshrl.u32 %v290_v27, 16  ;;  %v319_v32 = vshll.u32 %v290_v27, 16  ;;  %v325_v33 = vshll.u32 %v1459_v28, 16  ;;  %v329_v34 = vshrl.u32 %v1459_v28, 16  ;;  %v1270_v46 = vld [vmem:[%s1589_s1 + $0xf0] ss:$8 sps:$4 sm:$0xff]   ;;  %vm1484_vm2 = vmor %vm312_vm0, %vm313_vm1 }
  0x14   : > { %v335_v36 = vshll.u32 %v1465_v30, 16  ;;  %v1271_v48 = vld [vmem:[%s1589_s1 + $0x70] ss:$8 sps:$4 sm:$0xff]   ;;  %v1274_v51 = vld [vmem:[%s1589_s1 + $0x104] ss:$8 sps:$4 sm:$0xff]   ;;  %v1101_v56 = vcombine.low %v290_v27, %v1459_v28  ;;  %vm674_vm5 = vmor %vm672_vm3, %vm673_vm4  ;;  %s1161_s11 = sshll.u32 %s1600_s29, 4 }
  0x15   : > { %475 = vmatpush1.bf16.msra.mxu1 %v1246_v15  ;;  %620 = vmatpush1.bf16.msra.mxu0 %v1247_v16  ;;  %v318_v38 = vrot.slane %v316_v31, 4  ;;  %v321_v39 = vrot.slane %v319_v32, 5  ;;  %v327_v40 = vrot.slane %v325_v33, 5  ;;  %v331_v41 = vrot.slane %v329_v34, 4  ;;  %v1272_v55 = vld [vmem:[%s1589_s1 + $0x100] ss:$8 sps:$4 sm:$0xff]   ;;  %s286_s14 = scalar_lea.vmem %s1592_s4, %s1161_s11 }
  0x16   : > { %476 = vmatprep.subr.bf16.mxu1 %v1248_v17  ;;  %621 = vmatprep.subr.bf16.mxu0 %v1250_v18  ;;  %v337_v45 = vrot.slane %v335_v36, 5  ;;  %v1278_v57 = vld [vmem:[%s1589_s1 + $0x114] ss:$8 sps:$4 sm:$0xff]   ;;  %v292_v58 = vld [vmem:[%s1443_s22 + $0xc] sm:$0xf] }
  0x17   : > { %v322_v43 = vor.u32 %v321_v39, %v318_v38  ;;  %v332_v44 = vor.u32 %v331_v41, %v327_v40  ;;  %v1507_v59 = vld [vmem:[%s1443_s22 + $0x10] sm:$0xf]  ;;  %v1510_v60 = vld [vmem:[%s1443_s22 + $0x14] sm:$0x1]  ;;  %v340_v61 = vshrl.u32 %v292_v58, 16  ;;  %v343_v62 = vshll.u32 %v292_v58, 16 }
  0x18   : > { %v349_v63 = vshll.u32 %v1507_v59, 16  ;;  %v353_v0 = vshrl.u32 %v1507_v59, 16  ;;  %v359_v1 = vshll.u32 %v1510_v60, 16  ;;  %v1276_v7 = vld [vmem:[%s1589_s1 + $0x110] ss:$8 sps:$4 sm:$0xff]   ;;  %v1102_v14 = vcombine.low %v292_v58, %v1507_v59 }
  0x19   : > { %477 = vmatpush1.bf16.msra.mxu1 %v1252_v19  ;;  %622 = vmatpush1.bf16.msra.mxu0 %v1253_v20  ;;  %v323_v49 = vrot.slane %v322_v43, 4  ;;  %v333_v50 = vrot.slane %v332_v44, 4  ;;  %v342_v3 = vrot.slane %v340_v61, 4  ;;  %v345_v4 = vrot.slane %v343_v62, 5  ;;  %v1281_v9 = vld [vmem:[%s1589_s1 + $0x124] ss:$8 sps:$4 sm:$0xff]  }
  0x1a   : > { %478 = vmatprep.subr.bf16.mxu1 %v1254_v21  ;;  %623 = vmatprep.subr.bf16.mxu0 %v1256_v22  ;;  %v351_v5 = vrot.slane %v349_v63, 5  ;;  %v355_v6 = vrot.slane %v353_v0, 4  ;;  %v361_v11 = vrot.slane %v359_v1, 5  ;;  %v1279_v15 = vld [vmem:[%s1589_s1 + $0x120] ss:$8 sps:$4 sm:$0xff]   ;;  %v687_v32 = vrot.slane %v1510_v60, 5 }
  0x1b   : > { %v328_v52 = vsel %vm1484_vm2, %v323_v49, %v327_v40  ;;  %v338_v53 = vsel %vm1484_vm2, %v333_v50, %v337_v45  ;;  %v346_v8 = vor.u32 %v345_v4, %v342_v3  ;;  %v1284_v17 = vld [vmem:[%s1589_s1 + $0x134] ss:$8 sps:$4 sm:$0xff]   ;;  %v1282_v20 = vld [vmem:[%s1589_s1 + $0x130] ss:$8 sps:$4 sm:$0xff]   ;;  %v1287_v21 = vld [vmem:[%s1589_s1 + $0x144] ss:$8 sps:$4 sm:$0xff]   ;;  %v857_v60 = vlaneseq }
  0x1c   : > { %v1083_v54 = vcombine.low %v328_v52, %v338_v53  ;;  %v356_v10 = vor.u32 %v355_v6, %v351_v5  ;;  %v1285_v22 = vld [vmem:[%s1589_s1 + $0x140] ss:$8 sps:$4 sm:$0xff]   ;;  %v1295_v38 = vld [vmem:[%s1589_s1 + $0x170] ss:$8 sps:$4 sm:$0xff]  }
  0x1d   : > { %479 = vmatpush1.bf16.msra.mxu1 %v1258_v23  ;;  %624 = vmatpush1.bf16.msra.mxu0 %v1259_v24  ;;  %v347_v12 = vrot.slane %v346_v8, 4  ;;  %v1290_v23 = vld [vmem:[%s1589_s1 + $0x154] ss:$8 sps:$4 sm:$0xff]   ;;  %v677_v24 = vrot.slane %v1459_v28, 5  ;;  %v666_v27 = vld [vmem:[%s1443_s22] sm:$0xe] }
  0x1e   : > { %480 = vmatprep.subr.bf16.mxu1 %v1260_v25  ;;  %625 = vmatprep.subr.bf16.mxu0 %v1262_v26  ;;  %v357_v13 = vrot.slane %v356_v10, 4  ;;  %v684_v25 = vrot.slane %v1507_v59, 5  ;;  %v1294_v26 = vld [vmem:[%s1589_s1 + $0x164] ss:$8 sps:$4 sm:$0xff]   ;;  %v680_v28 = vrot.slane %v1465_v30, 5  ;;  %v1119_v34 = vrot.slane %v666_v27, 9 }
  0x1f   : > { %v352_v16 = vsel %vm1484_vm2, %v347_v12, %v351_v5  ;;  %v679_v31 = vrot.slane %v677_v24, 4  ;;  %v1292_v33 = vld [vmem:[%s1589_s1 + $0x160] ss:$8 sps:$4 sm:$0xff]   ;;  %v858_v61 = vshrl.u32 %v857_v60, 7 }
  0x20   : > { %v362_v18 = vsel %vm1484_vm2, %v357_v13, %v361_v11  ;;  %v686_v36 = vrot.slane %v684_v25, 4  ;;  %v678_v39 = vsel %vm674_vm5, %v1119_v34, %v677_v24  ;;  %v855_v63 = vld [vmem:[%s1590_s2] sm:$0x3] }
  0x21   : > { %481 = vmatpush1.bf16.msra.mxu1 %v1264_v29  ;;  %626 = vmatpush1.bf16.msra.mxu0 %v1265_v35  ;;  %v1084_v19 = vcombine.low %v352_v16, %v362_v18  ;;  %v667_v29 = vld [vmem:[%s1443_s22 + $0xc] sm:$0xe]  ;;  %v681_v30 = vsel %vm674_vm5, %v679_v31, %v680_v28  ;;  %v859_v62 = vsub.s32 0, %v858_v61  ;;  %v863_v0 = vsub.s32 1, %v858_v61  ;;  %v875_v1 = vld [vmem:[%s1591_s3] sm:$0x3] }
  0x22   : > { %482 = vmatprep.subr.bf16.mxu1 %v1266_v37  ;;  %627 = vmatprep.subr.bf16.mxu0 %v1268_v42  ;;  %v1120_v35 = vrot.slane %v667_v29, 9  ;;  %v1297_v37 = vld [vmem:[%s1589_s1 + $0x174] ss:$8 sps:$4 sm:$0xff]   ;;  %v688_v41 = vsel %vm674_vm5, %v686_v36, %v687_v32  ;;  %v1137_v42 = vcombine.low %v678_v39, %v681_v30 }
  0x23   : > { %v860_v3 = vrot.slane %v855_v63, %v859_v62  ;;  %v864_v6 = vrot.slane %v855_v63, %v863_v0  ;;  %v880_v8 = vrot.slane %v875_v1, %v859_v62  ;;  %v884_v13 = vrot.slane %v875_v1, %v863_v0 }
  0x24   : > { %v685_v40 = vsel %vm674_vm5, %v1120_v35, %v684_v25 }
  0x25   : > { %483 = vmatpush1.bf16.msra.mxu1 %v1270_v46  ;;  %628 = vmatpush1.bf16.msra.mxu0 %v1271_v48  ;;  %v1138_v43 = vcombine.low %v685_v40, %v688_v41 }
  0x26   : > { %794 = vmatprep.subr.bf16.mxu0 %v1274_v51  ;;  %1166 = vmatprep.subr.bf16.mxu1 %v1274_v51 }
  0x28   : > { %501 = vmatmul.mubr.bf16.vlgmr.msra.gmra.mrb[0].mxu1 %v1083_v54  ;;  %646 = vmatmul.mubr.bf16.vlgmr.msra.gmra.mrb[0].mxu0 %v1101_v56 }
  0x29   : > { %795 = vmatpush1.bf16.msra.mxu0 %v1272_v55  ;;  %1174 = vmatpush1.bf16.msra.mxu1 %v1272_v55 }
  0x2a   : > { %796 = vmatprep.subr.bf16.mxu0 %v1278_v57  ;;  %1167 = vmatprep.subr.bf16.mxu1 %v1278_v57 }
  0x2b   : > { %510 = vmatprep.mubr.bf16.mxu1 %v1322_v2  ;;  %655 = vmatprep.mubr.bf16.mxu0 %v1322_v2 }
  0x2d   : > { %797 = vmatpush1.bf16.msra.mxu0 %v1276_v7  ;;  %1175 = vmatpush1.bf16.msra.mxu1 %v1276_v7 }
  0x2e   : > { %798 = vmatprep.subr.bf16.mxu0 %v1281_v9  ;;  %1168 = vmatprep.subr.bf16.mxu1 %v1281_v9 }
  0x30   : > { %656 = vmatmul.mubr.bf16.gmra.mrb[4].mxu0 %v1102_v14  ;;  %511 = vmatmul.mubr.bf16.gmra.mrb[4].mxu1 %v1084_v19 }
  0x31   : > { %799 = vmatpush1.bf16.msra.mxu0 %v1279_v15  ;;  %1176 = vmatpush1.bf16.msra.mxu1 %v1279_v15 }
  0x32   : > { %800 = vmatprep.subr.bf16.mxu0 %v1284_v17  ;;  %1169 = vmatprep.subr.bf16.mxu1 %v1284_v17 }
  0x33   : > { %826 = vmatprep.mubr.bf16.mxu0 %v1322_v2  ;;  %836 = vmatprep.mubr.bf16.mxu1 %v1322_v2  ;;  %v1288_v2 = vld [vmem:[%s1589_s1 + $0x150] ss:$8 sps:$4 sm:$0xff]  }
  0x35   : > { %801 = vmatpush1.bf16.msra.mxu0 %v1282_v20  ;;  %1177 = vmatpush1.bf16.msra.mxu1 %v1282_v20 }
  0x36   : > { %802 = vmatprep.subr.bf16.mxu0 %v1287_v21  ;;  %1170 = vmatprep.subr.bf16.mxu1 %v1287_v21 }
  0x39   : > { %803 = vmatpush1.bf16.msra.mxu0 %v1285_v22  ;;  %1178 = vmatpush1.bf16.msra.mxu1 %v1285_v22 }
  0x3a   : > { %804 = vmatprep.subr.bf16.mxu0 %v1290_v23  ;;  %1171 = vmatprep.subr.bf16.mxu1 %v1290_v23 }
  0x3d   : > { %805 = vmatpush1.bf16.msra.mxu0 %v1288_v2  ;;  %1179 = vmatpush1.bf16.msra.mxu1 %v1288_v2 }
  0x3e   : > { %806 = vmatprep.subr.bf16.mxu0 %v1294_v26  ;;  %1172 = vmatprep.subr.bf16.mxu1 %v1294_v26 }
  0x41   : > { %807 = vmatpush1.bf16.msra.mxu0 %v1292_v33  ;;  %1180 = vmatpush1.bf16.msra.mxu1 %v1292_v33 }
  0x42   : > { %808 = vmatprep.subr.bf16.mxu0 %v1297_v37  ;;  %1173 = vmatprep.subr.bf16.mxu1 %v1297_v37 }
  0x45   : > { %809 = vmatpush1.bf16.msra.mxu0 %v1295_v38  ;;  %1181 = vmatpush1.bf16.msra.mxu1 %v1295_v38 }
  0x48   : > { %827 = vmatmul.mubr.bf16.vlgmr.msra.gmra.mrb[0].mxu0 %v1137_v42  ;;  %837 = vmatmul.mubr.bf16.vlgmr.msra.gmra.mrb[8].mxu1 %v1138_v43 }
  0xfb   : > { %v502_v44 = vpop.f32.mrb[0].mxu1 }
  0xfc   : > { %v504_v45 = vpop.f32.mrb[1].mxu1 }
  0xfd   : > { %v506_v46 = vpop.f32.mrb[2].mxu1 }
  0xfe   : > { %v508_v47 = vpop.f32.mrb[3].mxu1 }
 0x103   : > { %v657_v48 = vpop.f32.mrb[4].mxu0  ;;  %v512_v51 = vpop.f32.mrb[4].mxu1 }
 0x104   : > { %v659_v49 = vpop.f32.mrb[5].mxu0  ;;  %v658_v53 = vadd.f32 %v657_v48, %v512_v51  ;;  %v514_v54 = vpop.f32.mrb[5].mxu1 }
 0x105   : > { %v661_v50 = vpop.f32.mrb[6].mxu0  ;;  %v660_v55 = vadd.f32 %v659_v49, %v514_v54  ;;  %v516_v56 = vpop.f32.mrb[6].mxu1 }
 0x106   : > { %v663_v52 = vpop.f32.mrb[7].mxu0  ;;  %v662_v57 = vadd.f32 %v661_v50, %v516_v56  ;;  %v518_v58 = vpop.f32.mrb[7].mxu1 }
 0x107   : > { %v664_v59 = vadd.f32 %v663_v52, %v518_v58 }
 0x11b   : > { %v828_v4 = vpop.f32.mrb[0].mxu0  ;;  %v838_v5 = vpop.f32.mrb[8].mxu1 }
 0x11c   : > { %v1182_v7 = vadd.f32 %v828_v4, %v502_v44  ;;  %v851_v9 = vadd.f32 %v838_v5, %v658_v53  ;;  %v830_v10 = vpop.f32.mrb[1].mxu0  ;;  %v840_v11 = vpop.f32.mrb[9].mxu1 }
 0x11d   : > { %v1183_v12 = vadd.f32 %v830_v10, %v504_v45  ;;  %v852_v14 = vadd.f32 %v840_v11, %v660_v55  ;;  %v832_v15 = vpop.f32.mrb[2].mxu0  ;;  %v842_v16 = vpop.f32.mrb[10].mxu1 }
 0x11e   : > { %v867_v17 = vmul.f32 %v1182_v7, %v860_v3  ;;  %v871_v18 = vmul.f32 %v860_v3, %v851_v9  ;;  %v1184_v19 = vadd.f32 %v832_v15, %v506_v46  ;;  %v853_v20 = vadd.f32 %v842_v16, %v662_v57  ;;  %v834_v21 = vpop.f32.mrb[3].mxu0  ;;  %v844_v22 = vpop.f32.mrb[11].mxu1 }
 0x11f   : > { %v868_v23 = vmul.f32 %v1183_v12, %v864_v6  ;;  %v872_v24 = vmul.f32 %v864_v6, %v852_v14  ;;  %v1185_v2 = vadd.f32 %v834_v21, %v508_v47  ;;  %v854_v25 = vadd.f32 %v844_v22, %v664_v59 }
 0x120   : > { %v887_v26 = vadd.f32 %v880_v8, %v867_v17  ;;  %v891_v27 = vadd.f32 %v880_v8, %v871_v18  ;;  %v869_v29 = vmul.f32 %v1184_v19, %v860_v3  ;;  %v873_v28 = vmul.f32 %v860_v3, %v853_v20 }
 0x121   : > { %v888_v31 = vadd.f32 %v884_v13, %v868_v23  ;;  %v892_v32 = vadd.f32 %v884_v13, %v872_v24  ;;  %v870_v33 = vmul.f32 %v1185_v2, %v864_v6  ;;  %v874_v34 = vmul.f32 %v864_v6, %v854_v25 }
 0x122   : > { %v895_v35 = vmax.f32 %v887_v26, 0.0  ;;  %v899_v36 = vmax.f32 %v891_v27, 0.0  ;;  %v889_v37 = vadd.f32 %v880_v8, %v869_v29  ;;  %v893_v30 = vadd.f32 %v880_v8, %v873_v28 }
 0x123   : > { %v896_v38 = vmax.f32 %v888_v31, 0.0  ;;  %v900_v39 = vmax.f32 %v892_v32, 0.0  ;;  %v890_v40 = vadd.f32 %v884_v13, %v870_v33  ;;  %v894_v41 = vadd.f32 %v884_v13, %v874_v34 }
 0x124   : > { %v897_v42 = vmax.f32 %v889_v37, 0.0  ;;  %v901_v43 = vmax.f32 %v893_v30, 0.0 }
 0x125   : > { %v1162_v44 = vpack.c.bf16 %v896_v38, %v895_v35  ;;  %v1164_v45 = vpack.c.bf16 %v900_v39, %v899_v36  ;;  %v898_v46 = vmax.f32 %v890_v40, 0.0  ;;  %v902_v47 = vmax.f32 %v894_v41, 0.0 }
 0x127   : > { %927 = vst [vmem:[%s286_s14] sm:$0xff] %v1162_v44  ;;  %v1163_v48 = vpack.c.bf16 %v898_v46, %v897_v42  ;;  %v1165_v49 = vpack.c.bf16 %v902_v47, %v901_v43  ;;  %929 = vst [vmem:[%s286_s14 + $0x10] sm:$0xff] %v1164_v45 }
 0x129   : > { %928 = vst [vmem:[%s286_s14 + $0x8] sm:$0xff] %v1163_v48  ;;  %930 = vst [vmem:[%s286_s14 + $0x18] sm:$0xff] %v1165_v49 }
 0x12a PF: > { %s14_s17 = sadd.s32 1, %s1320_s17   ;;  %s1595_s15 = smov %s1316_s16 }
 0x12b   : > { %p11_p5 = scmp.ge.s32.totalorder %s14_s17, 4   ;;  %s1596_s16 = smov %s1598_s18 }
 0x12d   :  { %13 = sbr.rel (!%p11_p5) target bundleno = 2 (0x2), region = 77 }

</bundles_post_ra>
